<compile_context>
chip_gen: v5e
topology: v5e:2x2
jax: 0.10.0
libtpu: 0.0.40
codegen_flags: <defaults>
</compile_context>

<pallas_src>
import functools

import jax
import jax.numpy as jnp
from jax.experimental import pallas as pl
from jax.experimental.pallas import tpu as pltpu


# --------------------------- helpers -----------------------------------------

def _pick_tile(dim, target, align):
    """Largest `align`-multiple divisor of `dim` that is <= target (or the full dim)."""
    if dim <= target:
        return dim
    t = (target // align) * align
    while t >= align:
        if dim % t == 0:
            return t
        t -= align
    # No aligned divisor <= target: falling back to the full dim is only OK if it is not
    # enormously larger than the target (otherwise pad the dimension upstream).
    assert dim <= 4 * target, (
        f"_pick_tile: no {align}-aligned divisor of {dim} <= {target}; pad the dimension")
    return dim


def _vmem_limit(block_bytes):
    """Per-kernel VMEM request: double-buffered blocks + slack, capped below v7x physical."""
    need = 2 * block_bytes + (4 << 20)
    return int(min(48 * 1024 * 1024, max(8 * 1024 * 1024, need)))


# --------------------------- fused LayerNorm -> matmul ------------------------

def _ln_linear_kernel(x_ref, g_ref, bvec_ref, w_ref, b_ref, o_ref, xn_ref, *, activation):
    """LayerNorm (f32) computed once per row-tile (cached across the N axis in VMEM),
    then bf16 matmul (f32 acc) -> bias (+GELU).  K is un-tiled (K = D or 4D)."""
    @pl.when(pl.program_id(1) == 0)
    def _():
        x = x_ref[...].astype(jnp.float32)                   # (tm, K)
        mu = jnp.mean(x, axis=-1, keepdims=True)
        xc = x - mu
        var = jnp.mean(xc * xc, axis=-1, keepdims=True)
        xn = xc * jax.lax.rsqrt(var + 1e-5) * g_ref[...] + bvec_ref[...]
        xn_ref[...] = xn.astype(xn_ref.dtype)                # bf16 cache, reused for j > 0

    acc = jnp.dot(xn_ref[...], w_ref[...], preferred_element_type=jnp.float32)
    acc = acc + b_ref[...]
    if activation == "gelu":
        acc = jax.nn.gelu(acc, approximate=True)
    o_ref[...] = acc.astype(o_ref.dtype)


def ln_linear(x, g, beta, w, b, activation=None, out_dtype=jnp.float32):
    m, k = x.shape
    n = w.shape[1]
    tm = _pick_tile(m, 512, 16)       # 16-aligned: bf16 packs 16 rows per vreg
    tn = _pick_tile(n, 1024, 128)
    kernel = functools.partial(_ln_linear_kernel, activation=activation)
    blk_bytes = tm * k * 4 + 2 * k * 4 + k * tn * 2 + tn * 4 + tm * tn * 4 + tm * k * 2
    return pl.pallas_call(
        kernel,
        out_shape=jax.ShapeDtypeStruct((m, n), out_dtype),
        grid=(m // tm, n // tn),
        in_specs=[
            pl.BlockSpec((tm, k), lambda i, j: (i, 0)),
            pl.BlockSpec((1, k), lambda i, j: (0, 0)),
            pl.BlockSpec((1, k), lambda i, j: (0, 0)),
            pl.BlockSpec((k, tn), lambda i, j: (0, j)),
            pl.BlockSpec((1, tn), lambda i, j: (0, j)),
        ],
        out_specs=pl.BlockSpec((tm, tn), lambda i, j: (i, j)),
        scratch_shapes=[pltpu.VMEM((tm, k), jnp.bfloat16)],   # cached LN output
        compiler_params=pltpu.CompilerParams(
            # j (N axis) must run sequentially per row tile so the LN cache is valid.
            dimension_semantics=("parallel", "arbitrary"),
            vmem_limit_bytes=_vmem_limit(blk_bytes)),
    )(x, g.reshape(1, k).astype(jnp.float32), beta.reshape(1, k).astype(jnp.float32),
      w.astype(jnp.bfloat16), b.reshape(1, n).astype(jnp.float32))


# --------------------------- K-tiled matmul (+bias, +residual) ----------------

def _linear_kernel(x_ref, w_ref, b_ref, *rest, activation, has_residual):
    if has_residual:
        res_ref, o_ref, acc_ref = rest
    else:
        o_ref, acc_ref = rest
    kk = pl.program_id(2)

    @pl.when(kk == 0)
    def _():
        acc_ref[...] = jnp.zeros_like(acc_ref)

    acc_ref[...] += jnp.dot(x_ref[...], w_ref[...], preferred_element_type=jnp.float32)

    @pl.when(kk == pl.num_programs(2) - 1)
    def _():
        acc = acc_ref[...] + b_ref[...]
        if activation == "gelu":
            acc = jax.nn.gelu(acc, approximate=True)
        if has_residual:
            acc = acc + res_ref[...]
        o_ref[...] = acc.astype(o_ref.dtype)


def linear(x, w, b, residual=None, activation=None, out_dtype=jnp.float32):
    m, k = x.shape
    n = w.shape[1]
    tm = _pick_tile(m, 512, 16)
    tn = _pick_tile(n, 1024, 128)
    tk = _pick_tile(k, 512, 128)
    has_res = residual is not None
    kernel = functools.partial(_linear_kernel, activation=activation,
                               has_residual=has_res)
    in_specs = [
        pl.BlockSpec((tm, tk), lambda i, j, kk: (i, kk)),
        pl.BlockSpec((tk, tn), lambda i, j, kk: (kk, j)),
        pl.BlockSpec((1, tn), lambda i, j, kk: (0, j)),
    ]
    args = [x.astype(jnp.bfloat16), w.astype(jnp.bfloat16),
            b.reshape(1, n).astype(jnp.float32)]
    blk_bytes = tm * tk * 2 + tk * tn * 2 + tn * 4 + tm * tn * 4 + tm * tn * 4
    if has_res:
        in_specs.append(pl.BlockSpec((tm, tn), lambda i, j, kk: (i, j)))
        args.append(residual.astype(jnp.float32))
        blk_bytes += tm * tn * 4
    # TODO(synk): on v5e, carrying the residual stream / linear outputs in bf16 would
    #             roughly halve activation HBM traffic; kept f32 here for accuracy.
    return pl.pallas_call(
        kernel,
        out_shape=jax.ShapeDtypeStruct((m, n), out_dtype),
        grid=(m // tm, n // tn, k // tk),
        in_specs=in_specs,
        out_specs=pl.BlockSpec((tm, tn), lambda i, j, kk: (i, j)),
        scratch_shapes=[pltpu.VMEM((tm, tn), jnp.float32)],
        compiler_params=pltpu.CompilerParams(
            dimension_semantics=("parallel", "parallel", "arbitrary"),
            vmem_limit_bytes=_vmem_limit(blk_bytes)),
    )(*args)


# --------------------------- flash attention ----------------------------------

def _flash_attn_kernel(mask_ref, q_ref, k_ref, v_ref, o_ref, m_sc, l_sc, acc_sc,
                       *, causal, use_mask, tq, tk, scale):
    """Online-softmax attention for one (batch, head, q-tile); kv-tiles on the inner axis."""
    qi = pl.program_id(2)
    ki = pl.program_id(3)

    @pl.when(ki == 0)
    def _():
        m_sc[...] = jnp.full(m_sc.shape, -1e30, jnp.float32)
        l_sc[...] = jnp.zeros(l_sc.shape, jnp.float32)
        acc_sc[...] = jnp.zeros(acc_sc.shape, jnp.float32)

    def _update():
        s = jax.lax.dot_general(q_ref[...], k_ref[...], (((1,), (1,)), ((), ())),
                                preferred_element_type=jnp.float32) * scale   # (tq, tk)
        if causal:
            qpos = qi * tq + jax.lax.broadcasted_iota(jnp.int32, (tq, tk), 0)
            kpos = ki * tk + jax.lax.broadcasted_iota(jnp.int32, (tq, tk), 1)
            s = jnp.where(kpos <= qpos, s, -1e30)
        if use_mask:
            s = jnp.where(mask_ref[...] > 0, s, -1e30)        # (1, tk) broadcast
        m_prev = m_sc[...]
        m_new = jnp.maximum(m_prev, jnp.max(s, axis=-1, keepdims=True))
        alpha = jnp.exp(m_prev - m_new)
        p = jnp.exp(s - m_new)
        l_sc[...] = alpha * l_sc[...] + jnp.sum(p, axis=-1, keepdims=True)
        acc_sc[...] = alpha * acc_sc[...] + jax.lax.dot_general(
            p.astype(v_ref.dtype), v_ref[...], (((1,), (0,)), ((), ())),
            preferred_element_type=jnp.float32)
        m_sc[...] = m_new

    if causal:
        @pl.when(ki * tk <= qi * tq + (tq - 1))   # skip kv blocks fully above the diagonal
        def _():
            _update()
    else:
        _update()

    @pl.when(ki == pl.num_programs(3) - 1)
    def _():
        o_ref[...] = (acc_sc[...] * pl.reciprocal(l_sc[...], approx=True)
                      ).astype(o_ref.dtype)


def attention(qkv, a_mask, n_heads, causal):
    b, s, d3 = qkv.shape
    d = d3 // 3
    dh = d // n_heads
    # Head-major pre-layout (wrapper-side XLA transpose) so every per-head q/k/v block is a
    # contiguous, tile-aligned (tile, Dh) slab — no non-128-aligned lane slices in-kernel.
    qkv_hm = qkv.reshape(b, s, 3, n_heads, dh).transpose(2, 0, 3, 1, 4)   # (3, B, H, S, Dh)
    q, k, v = qkv_hm[0], qkv_hm[1], qkv_hm[2]
    mask3 = a_mask.reshape(b, 1, s)

    tq = _pick_tile(s, 256, 8)
    tk = _pick_tile(s, 512, 8)        # wide KV score tiles to keep MXU passes full
    scale = 1.0 / (dh ** 0.5)
    kernel = functools.partial(_flash_attn_kernel, causal=causal,
                               use_mask=not causal, tq=tq, tk=tk, scale=scale)
    blk_bytes = (tq * dh * 2 + 2 * tk * dh * 2 + tk * 4 + tq * dh * 2
                 + tq * dh * 4 + 2 * tq * 4)
    out_hm = pl.pallas_call(
        kernel,
        out_shape=jax.ShapeDtypeStruct((b, n_heads, s, dh), jnp.bfloat16),
        grid=(b, n_heads, s // tq, s // tk),
        in_specs=[
            pl.BlockSpec((pl.Squeezed(), 1, tk), lambda bi, h, qi, ki: (bi, 0, ki)),
            pl.BlockSpec((pl.Squeezed(), pl.Squeezed(), tq, dh),
                         lambda bi, h, qi, ki: (bi, h, qi, 0)),
            pl.BlockSpec((pl.Squeezed(), pl.Squeezed(), tk, dh),
                         lambda bi, h, qi, ki: (bi, h, ki, 0)),
            pl.BlockSpec((pl.Squeezed(), pl.Squeezed(), tk, dh),
                         lambda bi, h, qi, ki: (bi, h, ki, 0)),
        ],
        out_specs=pl.BlockSpec((pl.Squeezed(), pl.Squeezed(), tq, dh),
                               lambda bi, h, qi, ki: (bi, h, qi, 0)),
        scratch_shapes=[pltpu.VMEM((tq, 1), jnp.float32),    # running max
                        pltpu.VMEM((tq, 1), jnp.float32),    # running denom
                        pltpu.VMEM((tq, dh), jnp.float32)],  # running output
        compiler_params=pltpu.CompilerParams(
            dimension_semantics=("parallel", "parallel", "parallel", "arbitrary"),
            vmem_limit_bytes=_vmem_limit(blk_bytes)),
    )(mask3, q, k, v)
    # back to token-major (B, S, D) for the projection matmul (layout plumbing only)
    return out_hm.transpose(0, 2, 1, 3).reshape(b, s, d)


# --------------------------- final gather + LayerNorm --------------------------

def _gather_ln_kernel(idx_ref, h_ref, g_ref, b_ref, o_ref):
    # h_ref view: exactly the selected (1, D) row (picked by the data-dependent index_map)
    x = h_ref[...].astype(jnp.float32)
    mu = jnp.mean(x, axis=-1, keepdims=True)
    xc = x - mu
    var = jnp.mean(xc * xc, axis=-1, keepdims=True)
    o_ref[...] = (xc * jax.lax.rsqrt(var + 1e-5) * g_ref[...] + b_ref[...]
                  ).astype(o_ref.dtype)


def gather_final_ln(h, idx, g, beta):
    """out[i] = LayerNorm(h[i, idx[i], :]); only the needed row is DMA'd per batch."""
    b, s, d = h.shape
    return pl.pallas_call(
        _gather_ln_kernel,
        out_shape=jax.ShapeDtypeStruct((b, d), jnp.float32),
        grid_spec=pltpu.PrefetchScalarGridSpec(
            num_scalar_prefetch=1,
            grid=(b,),
            in_specs=[
                pl.BlockSpec((pl.Squeezed(), 1, d),
                             lambda bi, idx_ref: (bi, idx_ref[bi], 0)),
                pl.BlockSpec((1, d), lambda bi, idx_ref: (0, 0)),
                pl.BlockSpec((1, d), lambda bi, idx_ref: (0, 0)),
            ],
            out_specs=pl.BlockSpec((1, d), lambda bi, idx_ref: (bi, 0)),
        ),
        compiler_params=pltpu.CompilerParams(
            dimension_semantics=("arbitrary",)),
    )(idx, h, g.reshape(1, d).astype(jnp.float32), beta.reshape(1, d).astype(jnp.float32))


# --------------------------- model glue --------------------------------------

def init_params(key, vocab, max_pos, d, n_layers):
    std = 0.02
    ks = jax.random.split(key, 2 + n_layers)
    params = {
        "wte": jax.random.normal(ks[0], (vocab, d)) * std,
        "wpe": jax.random.normal(ks[1], (max_pos, d)) * std,
        "lnf_g": jnp.ones((d,)), "lnf_b": jnp.zeros((d,)),
        "blocks": [],
    }
    for layer in range(n_layers):
        bk = jax.random.split(ks[2 + layer], 4)
        params["blocks"].append({
            "ln1_g": jnp.ones((d,)), "ln1_b": jnp.zeros((d,)),
            "ln2_g": jnp.ones((d,)), "ln2_b": jnp.zeros((d,)),
            "w_qkv": jax.random.normal(bk[0], (d, 3 * d)) * std,   # out dim = [3, H, Dh]
            "b_qkv": jnp.zeros((3 * d,)),
            "w_proj": jax.random.normal(bk[1], (d, d)) * std,
            "b_proj": jnp.zeros((d,)),
            "w_fc": jax.random.normal(bk[2], (d, 4 * d)) * std,
            "b_fc": jnp.zeros((4 * d,)),
            "w_out": jax.random.normal(bk[3], (4 * d, d)) * std,
            "b_out": jnp.zeros((d,)),
        })
    return params


def llm_forward(params, x, a, llm_name="GPT2", n_heads=4):
    """Pallas implementation of LLM_.forward(x, a)."""
    b, s = x.shape
    d = params["wte"].shape[1]
    # token + position embedding lookup stays a plain XLA gather (host-side)
    h = (params["wte"][x] + params["wpe"][jnp.arange(s)][None]).astype(jnp.float32)
    a32 = a.astype(jnp.int32)
    causal = (llm_name == "GPT2")     # GPT2 branch calls self.llm(x) with NO mask
    for p in params["blocks"]:
        h2 = h.reshape(b * s, d)
        qkv = ln_linear(h2, p["ln1_g"], p["ln1_b"], p["w_qkv"], p["b_qkv"],
                        out_dtype=jnp.bfloat16)                        # (B*S, 3D) bf16
        attn = attention(qkv.reshape(b, s, 3 * d), a32, n_heads, causal)   # (B,S,D) bf16
        h2 = linear(attn.reshape(b * s, d), p["w_proj"], p["b_proj"],
                    residual=h2, out_dtype=jnp.float32)                # h + proj
        m = ln_linear(h2, p["ln2_g"], p["ln2_b"], p["w_fc"], p["b_fc"],
                      activation="gelu", out_dtype=jnp.bfloat16)
        h2 = linear(m, p["w_out"], p["b_out"], residual=h2,
                    out_dtype=jnp.float32)                             # h + mlp
        h = h2.reshape(b, s, d)
    if llm_name == "GPT2":
        # indices = a.sum(1) - 1, clamped so an all-zero mask row cannot index block -1
        idx = jnp.maximum(jnp.sum(a, axis=1) - 1, 0).astype(jnp.int32)
    else:                                                              # 'BERT': [:, 0, :]
        idx = jnp.zeros((b,), jnp.int32)
    return gather_final_ln(h, idx, params["lnf_g"], params["lnf_b"])


# --------------------------- pure-JAX reference -------------------------------

def ref_forward(params, x, a, llm_name="GPT2", n_heads=4):
    f32, bf16 = jnp.float32, jnp.bfloat16

    def ln(t, g, bb):
        mu = jnp.mean(t, -1, keepdims=True)
        var = jnp.mean((t - mu) ** 2, -1, keepdims=True)
        return (t - mu) * jax.lax.rsqrt(var + 1e-5) * g + bb

    def mm(xx, ww):   # mirror the kernels: bf16 operands, f32 accumulation
        return jnp.dot(xx.astype(bf16), ww.astype(bf16), preferred_element_type=f32)

    b, s = x.shape
    d = params["wte"].shape[1]
    dh = d // n_heads
    h = (params["wte"][x] + params["wpe"][jnp.arange(s)][None]).astype(f32)
    if llm_name == "GPT2":
        bias = jnp.where(jnp.arange(s)[None, :] <= jnp.arange(s)[:, None], 0.0, -1e9)
        bias = jnp.broadcast_to(bias.astype(f32), (b, s, s))
    else:
        bias = jnp.broadcast_to(
            jnp.where(a[:, None, :] > 0, 0.0, -1e9).astype(f32), (b, s, s))
    for p in params["blocks"]:
        x2 = ln(h, p["ln1_g"], p["ln1_b"]).reshape(b * s, d)
        qkv = (mm(x2, p["w_qkv"]) + p["b_qkv"]).astype(bf16).reshape(b, s, 3, n_heads, dh)
        q, k, v = qkv[:, :, 0], qkv[:, :, 1], qkv[:, :, 2]
        sc = jnp.einsum("bqhd,bkhd->bhqk", q, k, preferred_element_type=f32) * (1.0 / dh ** 0.5)
        sc = sc + bias[:, None]
        pw = jax.nn.softmax(sc, axis=-1)
        o = jnp.einsum("bhqk,bkhd->bqhd", pw.astype(bf16), v, preferred_element_type=f32)
        o = o.reshape(b, s, d).astype(bf16)
        h = h + (mm(o.reshape(b * s, d), p["w_proj"]) + p["b_proj"]).reshape(b, s, d)
        x2 = ln(h, p["ln2_g"], p["ln2_b"]).reshape(b * s, d)
        m = jax.nn.gelu(mm(x2, p["w_fc"]) + p["b_fc"], approximate=True).astype(bf16)
        h = h + (mm(m, p["w_out"]) + p["b_out"]).reshape(b, s, d)
    hf = ln(h, params["lnf_g"], params["lnf_b"])
    if llm_name == "GPT2":
        idx = jnp.maximum(jnp.sum(a, 1) - 1, 0).astype(jnp.int32)
    else:
        idx = jnp.zeros((b,), jnp.int32)
    return hf[jnp.arange(b), idx]


# --------------------------- main ---------------------------------------------

if __name__ == "__main__":
    B, S, D, H, L, VOCAB = 2, 8, 32, 4, 2, 64

    key = jax.random.PRNGKey(0)
    pkey, xkey = jax.random.split(key)
    params = init_params(pkey, VOCAB, S, D, L)

    x = jax.random.randint(xkey, (B, S), 0, VOCAB, dtype=jnp.int32)
    # attention mask: first row fully valid, second row padded after 5 tokens
    a = jnp.array([[1, 1, 1, 1, 1, 1, 1, 1],
                   [1, 1, 1, 1, 1, 0, 0, 0]], dtype=jnp.int32)

    for name in ("GPT2", "BERT"):
        out = jax.block_until_ready(llm_forward(params, x, a, llm_name=name, n_heads=H))
        ref = jax.block_until_ready(ref_forward(params, x, a, llm_name=name, n_heads=H))
        assert out.shape == (B, D)
        # bf16 matmuls + approx softmax reciprocal vs the mirrored f32-accum reference
        assert jnp.allclose(out, ref, atol=1e-2, rtol=1e-2), f"mismatch vs reference ({name})"

    print("KERNEL_OK")
</pallas_src>

<mosaic_0001>
module attributes {stable_mosaic.version = 11 : i64} {
  func.func @_ln_linear_kernel(%arg0: i32, %arg1: i32, %arg2: memref<16x32xf32, #tpu.memory_space<vmem>>, %arg3: memref<1x32xf32, #tpu.memory_space<vmem>>, %arg4: memref<1x32xf32, #tpu.memory_space<vmem>>, %arg5: memref<32x96xbf16, #tpu.memory_space<vmem>>, %arg6: memref<1x96xf32, #tpu.memory_space<vmem>>, %arg7: memref<16x96xbf16, #tpu.memory_space<vmem>>, %arg8: memref<16x32xbf16, #tpu.memory_space<vmem>>) attributes {dimension_semantics = [#tpu.dimension_semantics<parallel>, #tpu.dimension_semantics<arbitrary>], iteration_bounds = array<i64: 1, 1>, scalar_prefetch = 0 : i64, scratch_operands = 1 : i64, tpu.core_type = #tpu.core_type<tc>, window_params = [{transform_indices = @transform_0, window_bounds = array<i64: 16, 32>}, {pipeline_mode = #tpu.pipeline_mode<synchronous>, transform_indices = @transform_1, window_bounds = array<i64: 1, 32>}, {pipeline_mode = #tpu.pipeline_mode<synchronous>, transform_indices = @transform_2, window_bounds = array<i64: 1, 32>}, {transform_indices = @transform_3, window_bounds = array<i64: 32, 96>}, {transform_indices = @transform_4, window_bounds = array<i64: 1, 96>}, {transform_indices = @transform_5, window_bounds = array<i64: 16, 96>}]} {
    %c0_i32 = arith.constant 0 : i32
    %0 = arith.cmpi eq, %arg1, %c0_i32 : i32
    %1 = arith.extui %0 : i1 to i32
    %c0_i32_0 = arith.constant 0 : i32
    %2 = arith.cmpi ne, %1, %c0_i32_0 : i32
    scf.if %2 {
      %c0_8 = arith.constant 0 : index
      %c0_9 = arith.constant 0 : index
      %11 = vector.load %arg2[%c0_8, %c0_9] : memref<16x32xf32, #tpu.memory_space<vmem>>, vector<16x32xf32>
      %cst_10 = arith.constant dense<0.000000e+00> : vector<16xf32>
      %12 = vector.multi_reduction <add>, %11, %cst_10 [1] : vector<16x32xf32> to vector<16xf32>
      %13 = vector.shape_cast %12 : vector<16xf32> to vector<16x1xf32>
      %cst_11 = arith.constant 3.200000e+01 : f32
      %14 = vector.broadcast %cst_11 : f32 to vector<16x1xf32>
      %15 = arith.divf %13, %14 : vector<16x1xf32>
      %16 = vector.broadcast %15 : vector<16x1xf32> to vector<16x32xf32>
      %17 = arith.subf %11, %16 : vector<16x32xf32>
      %18 = arith.mulf %17, %17 : vector<16x32xf32>
      %cst_12 = arith.constant dense<0.000000e+00> : vector<16xf32>
      %19 = vector.multi_reduction <add>, %18, %cst_12 [1] : vector<16x32xf32> to vector<16xf32>
      %20 = vector.shape_cast %19 : vector<16xf32> to vector<16x1xf32>
      %cst_13 = arith.constant 3.200000e+01 : f32
      %21 = vector.broadcast %cst_13 : f32 to vector<16x1xf32>
      %22 = arith.divf %20, %21 : vector<16x1xf32>
      %cst_14 = arith.constant 9.99999974E-6 : f32
      %23 = vector.broadcast %cst_14 : f32 to vector<16x1xf32>
      %24 = arith.addf %22, %23 : vector<16x1xf32>
      %25 = math.rsqrt %24 : vector<16x1xf32>
      %26 = vector.broadcast %25 : vector<16x1xf32> to vector<16x32xf32>
      %27 = arith.mulf %17, %26 : vector<16x32xf32>
      %c0_15 = arith.constant 0 : index
      %c0_16 = arith.constant 0 : index
      %28 = vector.load %arg3[%c0_15, %c0_16] : memref<1x32xf32, #tpu.memory_space<vmem>>, vector<1x32xf32>
      %29 = vector.broadcast %28 : vector<1x32xf32> to vector<16x32xf32>
      %30 = arith.mulf %27, %29 : vector<16x32xf32>
      %c0_17 = arith.constant 0 : index
      %c0_18 = arith.constant 0 : index
      %31 = vector.load %arg4[%c0_17, %c0_18] : memref<1x32xf32, #tpu.memory_space<vmem>>, vector<1x32xf32>
      %32 = vector.broadcast %31 : vector<1x32xf32> to vector<16x32xf32>
      %33 = arith.addf %30, %32 : vector<16x32xf32>
      %34 = arith.truncf %33 : vector<16x32xf32> to vector<16x32xbf16>
      %c0_19 = arith.constant 0 : index
      %c0_20 = arith.constant 0 : index
      %35 = vector.load %arg8[%c0_19, %c0_20] : memref<16x32xbf16, #tpu.memory_space<vmem>>, vector<16x32xbf16>
      tpu.vector_store %arg8[%c0_19, %c0_20], %34 {strides = array<i32>} : memref<16x32xbf16, #tpu.memory_space<vmem>>, vector<16x32xbf16>,
    } else {
    }
    %c0 = arith.constant 0 : index
    %c0_1 = arith.constant 0 : index
    %3 = vector.load %arg8[%c0, %c0_1] : memref<16x32xbf16, #tpu.memory_space<vmem>>, vector<16x32xbf16>
    %c0_2 = arith.constant 0 : index
    %c0_3 = arith.constant 0 : index
    %4 = vector.load %arg5[%c0_2, %c0_3] : memref<32x96xbf16, #tpu.memory_space<vmem>>, vector<32x96xbf16>
    %cst = arith.constant dense<0.000000e+00> : vector<16x96xf32>
    %5 = tpu.matmul %3, %4, %cst {dimension_numbers = #tpu.dot_dimension_numbers<[1], [0], [0], [1], [0, 0, 1, 1], [], []>} : vector<16x32xbf16>, vector<32x96xbf16>, vector<16x96xf32> -> vector<16x96xf32>
    %c0_4 = arith.constant 0 : index
    %c0_5 = arith.constant 0 : index
    %6 = vector.load %arg6[%c0_4, %c0_5] : memref<1x96xf32, #tpu.memory_space<vmem>>, vector<1x96xf32>
    %7 = vector.broadcast %6 : vector<1x96xf32> to vector<16x96xf32>
    %8 = arith.addf %5, %7 : vector<16x96xf32>
    %9 = arith.truncf %8 : vector<16x96xf32> to vector<16x96xbf16>
    %c0_6 = arith.constant 0 : index
    %c0_7 = arith.constant 0 : index
    %10 = vector.load %arg7[%c0_6, %c0_7] : memref<16x96xbf16, #tpu.memory_space<vmem>>, vector<16x96xbf16>
    tpu.vector_store %arg7[%c0_6, %c0_7], %9 {strides = array<i32>} : memref<16x96xbf16, #tpu.memory_space<vmem>>, vector<16x96xbf16>,
    return
  }
  func.func @transform_0(%arg0: i32, %arg1: i32) -> (i32, i32) {
    %c0_i32 = arith.constant 0 : i32
    %c0_i32_0 = arith.constant 0 : i32
    return %arg0, %c0_i32 : i32, i32
  }
  func.func @transform_1(%arg0: i32, %arg1: i32) -> (i32, i32) {
    %c0_i32 = arith.constant 0 : i32
    %c0_i32_0 = arith.constant 0 : i32
    %c0_i32_1 = arith.constant 0 : i32
    return %c0_i32, %c0_i32_0 : i32, i32
  }
  func.func @transform_2(%arg0: i32, %arg1: i32) -> (i32, i32) {
    %c0_i32 = arith.constant 0 : i32
    %c0_i32_0 = arith.constant 0 : i32
    %c0_i32_1 = arith.constant 0 : i32
    return %c0_i32, %c0_i32_0 : i32, i32
  }
  func.func @transform_3(%arg0: i32, %arg1: i32) -> (i32, i32) {
    %c0_i32 = arith.constant 0 : i32
    %c0_i32_0 = arith.constant 0 : i32
    return %c0_i32, %arg1 : i32, i32
  }
  func.func @transform_4(%arg0: i32, %arg1: i32) -> (i32, i32) {
    %c0_i32 = arith.constant 0 : i32
    %c0_i32_0 = arith.constant 0 : i32
    return %c0_i32, %arg1 : i32, i32
  }
  func.func @transform_5(%arg0: i32, %arg1: i32) -> (i32, i32) {
    %c0_i32 = arith.constant 0 : i32
    return %arg0, %arg1 : i32, i32
  }
}

</mosaic_0001>

<bundles_post_ra>
// kernel: tpu_custom_call.1
= control target key start
LH: loop header
LB: loop body
LE: loop exit
PB: predicated region body
PF: predicated region fallthrough
CT: control target
= control target key end

     0   :  { %10 = vsyncpa [#allocation4], 0  ;;  %s416_s0 = inlined_call_operand.hbm [shape: f32[16,32], index: 0, kind: input, shape index: {}]   ;;  %s417_s1 = inlined_call_operand.hbm [shape: f32[1,32], index: 1, kind: input, shape index: {}]   ;;  %s418_s2 = inlined_call_operand.vmem [shape: f32[1,32], index: 2, kind: input, shape index: {}]   ;;  %s419_s3 = inlined_call_operand.hbm [shape: bf16[32,96], index: 3, kind: input, shape index: {}]   ;;  %s420_s4 = inlined_call_operand.vmem [shape: f32[1,96], index: 4, kind: input, shape index: {}]   ;;  %s421_s5 = inlined_call_operand.hbm [shape: bf16[16,96], index: 5, kind: output, shape index: {}]  }
   0x1   :  { %11 = vsyncpa [#allocation7], 0  ;;  %s31_s20 = sshll.u32 %s417_s1, 4  ;;  %s32_s20 = int_to_ptr.hbm [resolvable:$true] %s31_s20 }
   0x2   :  { %12 = vsyncpa [#allocation5], 0  ;;  %s348_s21 = smov [#allocation6]   ;;  %s17_s25 = sshll.u32 %s416_s0, 4  ;;  %s18_s25 = int_to_ptr.hbm [resolvable:$true] %s17_s25 }
   0x3   :  { %s33_s22 = sshll.u32 %s348_s21, 4  ;;  %s349_s26 = smov [#allocation3]   ;;  %s34_s22 = int_to_ptr.vmem [resolvable:$true] %s33_s22 }
   0x4   :  { %36 = dma.hbm_to_vmem [thread:$0]  %s32_s20, 16, %s34_s22, [#allocation7]  }
   0x5   :  { %s19_s27 = sshll.u32 %s349_s26, 4  ;;  %s350_s28 = smov 128   ;;  %s20_s27 = int_to_ptr.vmem [resolvable:$true] %s19_s27 }
   0x6   :  { %s351_s29 = smov 8   ;;  %s43_s1 = sshll.u32 %s419_s3, 4  ;;  %s44_s1 = int_to_ptr.hbm [resolvable:$true] %s43_s1 }
   0x7   :  { %25 = dma.hbm_to_vmem [thread:$0]  %s18_s25, 256, %s20_s27, [#allocation4], %s350_s28, %s350_s28, %s351_s29  }
   0x8   :  { %s352_s7 = smov [#allocation8]   ;;  %s353_s9 = smov 64  }
   0x9   :  { %s45_s8 = sshll.u32 %s352_s7, 4  ;;  %s354_s10 = smov 4   ;;  %s46_s8 = int_to_ptr.vmem [resolvable:$true] %s45_s8 }
   0xa   :  { %51 = dma.hbm_to_vmem [thread:$0]  %s44_s1, 256, %s46_s8, [#allocation7], %s353_s9, %s353_s9, %s354_s10  }
   0xb   :  { %342 = dma.done.wait [#allocation4], 256  }
   0xc   :  { %343 = vsyncadd [#allocation4], 4294967040 }
   0xd   :  { %344 = dma.done.wait [#allocation7], 272  }
   0xe   :  { %345 = vsyncadd [#allocation7], 4294967024  ;;  %vm73_vm0 = vcmask 261120   ;;  %v71_v0 = vld [vmem:[#allocation3] sm:$0xff]  ;;  %v72_v2 = vld [vmem:[#allocation3 + $0x8] sm:$0xff]  ;;  %v355_v4 = vmov 32.0  }
   0xf   :  { %v74_v1 = vsel %vm73_vm0, %v71_v0, 0.0  ;;  %v77_v3 = vsel %vm73_vm0, %v72_v2, 0.0  ;;  %240 = vrcp.f32 %v355_v4  ;;  %v227_v24 = vld [vmem:[#allocation8 + $0x8] sm:$0xff]  ;;  %v226_v27 = vld [vmem:[#allocation8] sm:$0xff]  ;;  %v237_v37 = vld [vmem:[#allocation6] ss:$0 sm:$0xff] }
  0x10   :  { %75 = vadd.xlane.f32.xlu0 %v74_v1  ;;  %179 = vmatpush.bf16.msra.mxu0 %v227_v24  ;;  %v238_v40 = vld [vmem:[%s418_s2] ss:$0 sm:$0xff]  ;;  %vm139_vm6 = vcmask 257024   ;;  %vm189_vm9 = vcmask 781312   ;;  %s356_s12 = smov [#allocation9]   ;;  %s198_s16 = sshll.u32 %s421_s5, 4  ;;  %s199_s16 = int_to_ptr.hbm [resolvable:$true] %s198_s16 }
  0x11   :  { %v239_v54 = vld [vmem:[%s420_s4] ss:$0 sm:$0xff]  ;;  %s196_s13 = sshll.u32 %s356_s12, 4  ;;  %s197_s13 = int_to_ptr.vmem [resolvable:$true] %s196_s13 }
  0x14   :  { %180 = vmatpush.bf16.msra.mxu0 %v226_v27 }
  0x15   :  { %v241_v5 = vpop.eup %240 }
  0x16   :  { %v81_v6 = vmul.f32 32.0, %v241_v5  ;;  %vm85_vm1 = vweird.f32 %v241_v5 }
  0x18   :  { %78 = vadd.xlane.f32.xlu0 %v77_v3  ;;  %v82_v7 = vsub.f32 1.0, %v81_v6 }
  0x1a   :  { %v83_v8 = vmul.f32 %v241_v5, %v82_v7 }
  0x1c   :  { %v84_v9 = vadd.f32 %v241_v5, %v83_v8 }
  0x1e   :  { %v86_v10 = vsel %vm85_vm1, %v241_v5, %v84_v9 }
  0x83   :  { %v76_v11 = vpop.xlane.xlu0 %75 }
  0x84   :  { %v87_v12 = vmul.f32 %v86_v10, %v76_v11 }
  0x86   :  { %v89_v13 = vsub.f32 %v71_v0, %v87_v12 }
  0x88   :  { %v91_v14 = vmul.f32 %v89_v13, %v89_v13 }
  0x8a   :  { %v93_v15 = vsel %vm73_vm0, %v91_v14, 0.0 }
  0x8b   :  { %94 = vadd.xlane.f32.xlu1 %v93_v15  ;;  %v79_v16 = vpop.xlane.xlu0 %78 }
  0x8c   :  { %v88_v17 = vmul.f32 %v86_v10, %v79_v16 }
  0x8e   :  { %v90_v18 = vsub.f32 %v72_v2, %v88_v17 }
  0x90   :  { %v92_v19 = vmul.f32 %v90_v18, %v90_v18 }
  0x92   :  { %v96_v20 = vsel %vm73_vm0, %v92_v19, 0.0 }
  0x93   :  { %97 = vadd.xlane.f32.xlu1 %v96_v20 }
  0xfe   :  { %v95_v21 = vpop.xlane.xlu1 %94 }
  0xff   :  { %v99_v22 = vmul.f32 %v95_v21, %v86_v10 }
 0x101   :  { %v101_v23 = vadd.f32 1e-05, %v99_v22 }
 0x103   :  { %242 = vrsqrt.f32 %v101_v23  ;;  %vm109_vm3 = vweird.f32 %v101_v23 }
 0x106   :  { %v98_v25 = vpop.xlane.xlu1 %97 }
 0x107   :  { %v100_v26 = vmul.f32 %v98_v25, %v86_v10 }
 0x109   :  { %v243_v28 = vpop.eup %242  ;;  %v102_v29 = vadd.f32 1e-05, %v100_v26 }
 0x10a   :  { %v104_v30 = vmul.f32 %v243_v28, %v101_v23  ;;  %vm110_vm2 = vweird.f32 %v243_v28 }
 0x10b   :  { %244 = vrsqrt.f32 %v102_v29  ;;  %vm111_vm4 = vmor %vm109_vm3, %vm110_vm2  ;;  %vm119_vm7 = vweird.f32 %v102_v29 }
 0x10c   :  { %v105_v31 = vmul.f32 %v243_v28, %v104_v30 }
 0x10e   :  { %v106_v32 = vmul.f32 0.5, %v105_v31 }
 0x110   :  { %v107_v33 = vsub.f32 1.5, %v106_v32 }
 0x111   :  { %v245_v34 = vpop.eup %244 }
 0x112   :  { %v108_v35 = vmul.f32 %v243_v28, %v107_v33  ;;  %v114_v36 = vmul.f32 %v245_v34, %v102_v29  ;;  %vm120_vm5 = vweird.f32 %v245_v34 }
 0x113   :  { %vm121_vm8 = vmor %vm119_vm7, %vm120_vm5 }
 0x114   :  { %v112_v38 = vsel %vm111_vm4, %v243_v28, %v108_v35  ;;  %v115_v39 = vmul.f32 %v245_v34, %v114_v36 }
 0x115   :  { %v123_v41 = vmul.f32 %v112_v38, %v89_v13 }
 0x116   :  { %v116_v42 = vmul.f32 0.5, %v115_v39 }
 0x117   :  { %v129_v43 = vmul.f32 %v237_v37, %v123_v41 }
 0x118   :  { %v117_v44 = vsub.f32 1.5, %v116_v42 }
 0x119   :  { %v135_v45 = vadd.f32 %v238_v40, %v129_v43 }
 0x11a   :  { %v118_v46 = vmul.f32 %v245_v34, %v117_v44 }
 0x11b   :  { %v137_v47 = vpack.c.bf16 %v135_v45, %v135_v45 }
 0x11c   :  { %v122_v48 = vsel %vm121_vm8, %v245_v34, %v118_v46 }
 0x11d   :  { %140 = vst.msk [vmem:[#allocation2] sm:$0xf] %vm139_vm6, %v137_v47  ;;  %v124_v49 = vmul.f32 %v122_v48, %v90_v18 }
 0x11f   :  { %v130_v50 = vmul.f32 %v237_v37, %v124_v49 }
 0x121   :  { %v136_v51 = vadd.f32 %v238_v40, %v130_v50 }
 0x123   :  { %v138_v52 = vpack.c.bf16 %v136_v51, %v136_v51 }
 0x125   :  { %141 = vst.msk [vmem:[#allocation2 + $0x4] sm:$0xf] %vm139_vm6, %v138_v52 }
 0x12c   :  { %v225_v53 = vld [vmem:[#allocation2] sm:$0xff] }
 0x12d   :  { %224 = vmatmul.msk.bf16.vlgmr.msra.gmra.mxu0 %vm73_vm0, %v225_v53 }
 0x1aa   :  { %v182_v55 = vpop.f32.mrf.mxu0 }
 0x1ab   :  { %v183_v56 = vadd.f32 %v239_v54, %v182_v55 }
 0x1ad   :  { %v187_v57 = vpack.c.bf16 %v183_v56, %v183_v56 }
 0x1af   :  { %190 = vst.msk [vmem:[#allocation9] sm:$0xf] %vm189_vm9, %v187_v57 }
 0x1b2   :  { %v184_v58 = vpop.f32.mrf.mxu0 }
 0x1b3   :  { %v185_v59 = vadd.f32 %v239_v54, %v184_v58 }
 0x1b5   :  { %v188_v60 = vpack.c.bf16 %v185_v59, %v185_v59 }
 0x1b7   :  { %191 = vst.msk [vmem:[#allocation9 + $0x4] sm:$0xf] %vm189_vm9, %v188_v60 }
 0x1b8   :  { %204 = dma.vmem_to_hbm [thread:$0]  %s197_s13, 128, %s199_s16, [#allocation5], %s353_s9, %s353_s9, %s354_s10  }
 0x1b9   :  { %346 = dma.done.wait [#allocation5], 128  }
 0x1ba   :  { %347 = vsyncadd [#allocation5], 4294967168 }
 0x1bb   :  { %209 = vsyncpa [#allocation4], 1 }
 0x1bc   :  { %210 = vsyncpa [#allocation7], 1 }
 0x1bd   :  { %211 = vsyncpa [#allocation5], 1 }

</bundles_post_ra>
